<compile_context>
chip_gen: v6e
topology: v6e:2x2x1
jax: 0.10.0
libtpu: 0.0.40
codegen_flags: <defaults>
</compile_context>

<pallas_src>
import functools

import jax
import jax.numpy as jnp
from jax.experimental import pallas as pl
from jax.experimental.pallas import tpu as pltpu


def _ftn_kernel(x_ref, w1_ref, b1_ref, w2_ref, b2_ref, alpha_ref, o_ref,
                *, G, Cin_g, Cout_g, use_mxu):
    # x_ref:  (1, Cin, T)  with Cin = G*Cin_g, spatial tile T on the lane axis
    # w1_ref: (G, Cout_g, Cin_g)   b1_ref: (G, Cout_g, 1)
    # w2_ref: (G, Cin_g, Cout_g)   b2_ref: (G, Cin_g, 1)
    # alpha_ref: (1,) in SMEM      o_ref:  (1, Cin, T)
    x = x_ref[0]                      # (Cin, T), native dtype (no blanket f32 copy)
    w1 = w1_ref[...]
    b1 = b1_ref[...]
    w2 = w2_ref[...]
    b2 = b2_ref[...]
    alpha = alpha_ref[0]

    outs = []
    for g in range(G):
        xg = x[g * Cin_g:(g + 1) * Cin_g, :]              # (Cin_g, T), static slice

        if use_mxu:
            h = jnp.dot(w1[g], xg.astype(jnp.float32),
                        preferred_element_type=jnp.float32) + b1[g]
        else:
            # conv1 as unrolled VPU FMAs: (Cout_g,1) x (1,T) broadcast per in-channel.
            h = b1[g]                                     # (Cout_g, 1) -> broadcasts
            for c in range(Cin_g):
                h = h + w1[g, :, c:c + 1] * xg[c:c + 1, :].astype(jnp.float32)

        # PReLU with a single shared slope.
        h = jnp.where(h > 0, h, alpha * h)                # (Cout_g, T), f32

        if use_mxu:
            y = jnp.dot(w2[g], h, preferred_element_type=jnp.float32) + b2[g]
        else:
            y = b2[g]                                     # (Cin_g, 1) -> broadcasts
            for o in range(Cout_g):
                y = y + w2[g, :, o:o + 1] * h[o:o + 1, :]

        outs.append(y + xg.astype(jnp.float32))           # residual, (Cin_g, T)

    # Single lane-dense store of the full output block.
    o_ref[0] = jnp.concatenate(outs, axis=0).astype(o_ref.dtype)


def ftn_forward(x_nchw, w1, b1, w2, b2, alpha, group_blocks, *, spatial_tile_cap=2048):
    """FTN forward pass.

    x_nchw : (N, in_nc, H, W)
    w1     : (out_nc, in_nc // G, 1, 1)   (PyTorch conv1 weight layout)
    b1     : (out_nc,)
    w2     : (in_nc, out_nc // G, 1, 1)   (PyTorch conv2 weight layout)
    b2     : (in_nc,)
    alpha  : scalar PReLU slope
    """
    N, Cin, H, W = x_nchw.shape
    Cout = w1.shape[0]
    G = group_blocks
    Cin_g, Cout_g = Cin // G, Cout // G
    HW = H * W

    # Contiguous reshape only -- no extra HBM round trips around the kernel.
    x3 = x_nchw.reshape(N, Cin, HW)

    # PyTorch grouped-conv params -> per-group matrices (tiny, kept in f32).
    w1_g = w1[:, :, 0, 0].reshape(G, Cout_g, Cin_g).astype(jnp.float32)
    b1_g = b1.reshape(G, Cout_g, 1).astype(jnp.float32)
    w2_g = w2[:, :, 0, 0].reshape(G, Cin_g, Cout_g).astype(jnp.float32)
    b2_g = b2.reshape(G, Cin_g, 1).astype(jnp.float32)
    alpha_arr = jnp.asarray(alpha, jnp.float32).reshape(1)

    # Lane-dense spatial tile: full extent if small, otherwise a multiple of 128
    # (a partial last tile is handled by Pallas masking; the op is elementwise
    #  along the spatial axis so padded lanes never contaminate valid outputs).
    if HW <= spatial_tile_cap:
        tile_hw = HW
    else:
        tile_hw = spatial_tile_cap - (spatial_tile_cap % 128)
    num_tiles = pl.cdiv(HW, tile_hw)

    # Tiny per-group channels -> VPU FMAs; wide groups -> MXU matmul.
    use_mxu = (Cin_g >= 32 and Cout_g >= 32)

    kernel = functools.partial(_ftn_kernel, G=G, Cin_g=Cin_g, Cout_g=Cout_g,
                               use_mxu=use_mxu)

    out3 = pl.pallas_call(
        kernel,
        out_shape=jax.ShapeDtypeStruct((N, Cin, HW), x_nchw.dtype),
        grid=(N, num_tiles),
        in_specs=[
            pl.BlockSpec((1, Cin, tile_hw), lambda n, t: (n, 0, t)),
            pl.BlockSpec((G, Cout_g, Cin_g), lambda n, t: (0, 0, 0)),
            pl.BlockSpec((G, Cout_g, 1), lambda n, t: (0, 0, 0)),
            pl.BlockSpec((G, Cin_g, Cout_g), lambda n, t: (0, 0, 0)),
            pl.BlockSpec((G, Cin_g, 1), lambda n, t: (0, 0, 0)),
            pl.BlockSpec(memory_space=pltpu.MemorySpace.SMEM),
        ],
        out_specs=pl.BlockSpec((1, Cin, tile_hw), lambda n, t: (n, 0, t)),
        compiler_params=pltpu.CompilerParams(
            dimension_semantics=("parallel", "parallel"),
        ),
    )(x3, w1_g, b1_g, w2_g, b2_g, alpha_arr)

    return out3.reshape(N, Cin, H, W)


def ftn_reference(x_nchw, w1, b1, w2, b2, alpha, group_blocks):
    """Pure-JAX reference mirroring the PyTorch forward (for verification)."""
    N, Cin, H, W = x_nchw.shape
    Cout = w1.shape[0]
    G = group_blocks
    Cin_g, Cout_g = Cin // G, Cout // G

    x = x_nchw.astype(jnp.float32)
    xg = x.reshape(N, G, Cin_g, H, W)
    w1g = w1[:, :, 0, 0].reshape(G, Cout_g, Cin_g)
    h = jnp.einsum("ngchw,goc->ngohw", xg, w1g).reshape(N, Cout, H, W)
    h = h + b1.reshape(1, Cout, 1, 1)
    h = jnp.where(h > 0, h, alpha * h)
    hg = h.reshape(N, G, Cout_g, H, W)
    w2g = w2[:, :, 0, 0].reshape(G, Cin_g, Cout_g)
    y = jnp.einsum("ngchw,goc->ngohw", hg, w2g).reshape(N, Cin, H, W)
    y = y + b2.reshape(1, Cin, 1, 1)
    return (y + x).astype(x_nchw.dtype)


if __name__ == "__main__":
    in_nc, out_nc, group_blocks = 4, 8, 2

    key = jax.random.PRNGKey(0)
    kx, k1, kb1, k2, kb2, kx2 = jax.random.split(key, 6)

    w1 = 0.1 * jax.random.normal(k1, (out_nc, in_nc // group_blocks, 1, 1), dtype=jnp.float32)
    b1 = 0.05 * jax.random.normal(kb1, (out_nc,), dtype=jnp.float32)
    w2 = 0.1 * jax.random.normal(k2, (in_nc, out_nc // group_blocks, 1, 1), dtype=jnp.float32)
    b2 = 0.05 * jax.random.normal(kb2, (in_nc,), dtype=jnp.float32)
    alpha = jnp.float32(1.0)  # nn.PReLU(init=1): single shared slope initialized to 1.0

    # Case 1: small spatial extent (single full-width tile).
    x = jax.random.normal(kx, (2, in_nc, 16, 16), dtype=jnp.float32)
    out = jax.block_until_ready(ftn_forward(x, w1, b1, w2, b2, alpha, group_blocks))
    ref = ftn_reference(x, w1, b1, w2, b2, alpha, group_blocks)
    assert out.shape == x.shape
    assert jnp.allclose(out, ref, atol=1e-5, rtol=1e-5), "Pallas output mismatch vs reference (16x16)"

    # Case 2: larger spatial extent exercising the tiled spatial grid axis.
    x_big = jax.random.normal(kx2, (2, in_nc, 64, 64), dtype=jnp.float32)
    out_big = jax.block_until_ready(ftn_forward(x_big, w1, b1, w2, b2, alpha, group_blocks))
    ref_big = ftn_reference(x_big, w1, b1, w2, b2, alpha, group_blocks)
    assert out_big.shape == x_big.shape
    assert jnp.allclose(out_big, ref_big, atol=1e-5, rtol=1e-5), "Pallas output mismatch vs reference (64x64)"

    print("KERNEL_OK")
</pallas_src>

<mosaic_0001>
module attributes {stable_mosaic.version = 11 : i64} {
  func.func @_ftn_kernel(%arg0: i32, %arg1: i32, %arg2: memref<1x4x256xf32, #tpu.memory_space<vmem>>, %arg3: memref<2x4x2xf32, #tpu.memory_space<vmem>>, %arg4: memref<2x4x1xf32, #tpu.memory_space<vmem>>, %arg5: memref<2x2x4xf32, #tpu.memory_space<vmem>>, %arg6: memref<2x2x1xf32, #tpu.memory_space<vmem>>, %arg7: memref<1xf32, #tpu.memory_space<smem>>, %arg8: memref<1x4x256xf32, #tpu.memory_space<vmem>>) attributes {dimension_semantics = [#tpu.dimension_semantics<parallel>, #tpu.dimension_semantics<parallel>], iteration_bounds = array<i64: 2, 1>, scalar_prefetch = 0 : i64, scratch_operands = 0 : i64, tpu.core_type = #tpu.core_type<tc>, window_params = [{transform_indices = @transform_0, window_bounds = array<i64: 1, 4, 256>}, {pipeline_mode = #tpu.pipeline_mode<synchronous>, transform_indices = @transform_1, window_bounds = array<i64: 2, 4, 2>}, {pipeline_mode = #tpu.pipeline_mode<synchronous>, transform_indices = @transform_2, window_bounds = array<i64: 2, 4, 1>}, {pipeline_mode = #tpu.pipeline_mode<synchronous>, transform_indices = @transform_3, window_bounds = array<i64: 2, 2, 4>}, {pipeline_mode = #tpu.pipeline_mode<synchronous>, transform_indices = @transform_4, window_bounds = array<i64: 2, 2, 1>}, {transform_indices = @transform_5, window_bounds = array<i64: 1>}, {transform_indices = @transform_6, window_bounds = array<i64: 1, 4, 256>}]} {
    %c0 = arith.constant 0 : index
    %c0_0 = arith.constant 0 : index
    %c0_1 = arith.constant 0 : index
    %0 = vector.load %arg2[%c0, %c0_0, %c0_1] : memref<1x4x256xf32, #tpu.memory_space<vmem>>, vector<1x4x256xf32>
    %1 = vector.shape_cast %0 : vector<1x4x256xf32> to vector<4x256xf32>
    %c0_2 = arith.constant 0 : index
    %c0_3 = arith.constant 0 : index
    %c0_4 = arith.constant 0 : index
    %2 = vector.load %arg3[%c0_2, %c0_3, %c0_4] : memref<2x4x2xf32, #tpu.memory_space<vmem>>, vector<2x4x2xf32>
    %c0_5 = arith.constant 0 : index
    %c0_6 = arith.constant 0 : index
    %c0_7 = arith.constant 0 : index
    %3 = vector.load %arg4[%c0_5, %c0_6, %c0_7] : memref<2x4x1xf32, #tpu.memory_space<vmem>>, vector<2x4x1xf32>
    %c0_8 = arith.constant 0 : index
    %c0_9 = arith.constant 0 : index
    %c0_10 = arith.constant 0 : index
    %4 = vector.load %arg5[%c0_8, %c0_9, %c0_10] : memref<2x2x4xf32, #tpu.memory_space<vmem>>, vector<2x2x4xf32>
    %c0_11 = arith.constant 0 : index
    %c0_12 = arith.constant 0 : index
    %c0_13 = arith.constant 0 : index
    %5 = vector.load %arg6[%c0_11, %c0_12, %c0_13] : memref<2x2x1xf32, #tpu.memory_space<vmem>>, vector<2x2x1xf32>
    %c0_14 = arith.constant 0 : index
    %6 = memref.load %arg7[%c0_14] : memref<1xf32, #tpu.memory_space<smem>>
    %7 = vector.extract_strided_slice %1 {offsets = [0, 0], sizes = [2, 256], strides = [1, 1]} : vector<4x256xf32> to vector<2x256xf32>
    %8 = vector.extract_strided_slice %3 {offsets = [0, 0, 0], sizes = [1, 4, 1], strides = [1, 1, 1]} : vector<2x4x1xf32> to vector<1x4x1xf32>
    %9 = vector.shape_cast %8 : vector<1x4x1xf32> to vector<4x1xf32>
    %10 = vector.extract_strided_slice %2 {offsets = [0, 0, 0], sizes = [1, 4, 1], strides = [1, 1, 1]} : vector<2x4x2xf32> to vector<1x4x1xf32>
    %11 = vector.shape_cast %10 : vector<1x4x1xf32> to vector<4x1xf32>
    %12 = vector.extract_strided_slice %7 {offsets = [0, 0], sizes = [1, 256], strides = [1, 1]} : vector<2x256xf32> to vector<1x256xf32>
    %13 = vector.broadcast %11 : vector<4x1xf32> to vector<4x256xf32>
    %14 = vector.broadcast %12 : vector<1x256xf32> to vector<4x256xf32>
    %15 = arith.mulf %13, %14 : vector<4x256xf32>
    %16 = vector.broadcast %9 : vector<4x1xf32> to vector<4x256xf32>
    %17 = arith.addf %16, %15 : vector<4x256xf32>
    %18 = vector.extract_strided_slice %2 {offsets = [0, 0, 1], sizes = [1, 4, 1], strides = [1, 1, 1]} : vector<2x4x2xf32> to vector<1x4x1xf32>
    %19 = vector.shape_cast %18 : vector<1x4x1xf32> to vector<4x1xf32>
    %20 = vector.extract_strided_slice %7 {offsets = [1, 0], sizes = [1, 256], strides = [1, 1]} : vector<2x256xf32> to vector<1x256xf32>
    %21 = vector.broadcast %19 : vector<4x1xf32> to vector<4x256xf32>
    %22 = vector.broadcast %20 : vector<1x256xf32> to vector<4x256xf32>
    %23 = arith.mulf %21, %22 : vector<4x256xf32>
    %24 = arith.addf %17, %23 : vector<4x256xf32>
    %cst = arith.constant 0.000000e+00 : f32
    %25 = vector.broadcast %cst : f32 to vector<4x256xf32>
    %26 = arith.cmpf ogt, %24, %25 : vector<4x256xf32>
    %27 = vector.broadcast %6 : f32 to vector<4x256xf32>
    %28 = arith.mulf %27, %24 : vector<4x256xf32>
    %29 = arith.select %26, %24, %28 : vector<4x256xi1>, vector<4x256xf32>
    %30 = vector.extract_strided_slice %5 {offsets = [0, 0, 0], sizes = [1, 2, 1], strides = [1, 1, 1]} : vector<2x2x1xf32> to vector<1x2x1xf32>
    %31 = vector.shape_cast %30 : vector<1x2x1xf32> to vector<2x1xf32>
    %32 = vector.extract_strided_slice %4 {offsets = [0, 0, 0], sizes = [1, 2, 1], strides = [1, 1, 1]} : vector<2x2x4xf32> to vector<1x2x1xf32>
    %33 = vector.shape_cast %32 : vector<1x2x1xf32> to vector<2x1xf32>
    %34 = vector.extract_strided_slice %29 {offsets = [0, 0], sizes = [1, 256], strides = [1, 1]} : vector<4x256xf32> to vector<1x256xf32>
    %35 = vector.broadcast %33 : vector<2x1xf32> to vector<2x256xf32>
    %36 = vector.broadcast %34 : vector<1x256xf32> to vector<2x256xf32>
    %37 = arith.mulf %35, %36 : vector<2x256xf32>
    %38 = vector.broadcast %31 : vector<2x1xf32> to vector<2x256xf32>
    %39 = arith.addf %38, %37 : vector<2x256xf32>
    %40 = vector.extract_strided_slice %4 {offsets = [0, 0, 1], sizes = [1, 2, 1], strides = [1, 1, 1]} : vector<2x2x4xf32> to vector<1x2x1xf32>
    %41 = vector.shape_cast %40 : vector<1x2x1xf32> to vector<2x1xf32>
    %42 = vector.extract_strided_slice %29 {offsets = [1, 0], sizes = [1, 256], strides = [1, 1]} : vector<4x256xf32> to vector<1x256xf32>
    %43 = vector.broadcast %41 : vector<2x1xf32> to vector<2x256xf32>
    %44 = vector.broadcast %42 : vector<1x256xf32> to vector<2x256xf32>
    %45 = arith.mulf %43, %44 : vector<2x256xf32>
    %46 = arith.addf %39, %45 : vector<2x256xf32>
    %47 = vector.extract_strided_slice %4 {offsets = [0, 0, 2], sizes = [1, 2, 1], strides = [1, 1, 1]} : vector<2x2x4xf32> to vector<1x2x1xf32>
    %48 = vector.shape_cast %47 : vector<1x2x1xf32> to vector<2x1xf32>
    %49 = vector.extract_strided_slice %29 {offsets = [2, 0], sizes = [1, 256], strides = [1, 1]} : vector<4x256xf32> to vector<1x256xf32>
    %50 = vector.broadcast %48 : vector<2x1xf32> to vector<2x256xf32>
    %51 = vector.broadcast %49 : vector<1x256xf32> to vector<2x256xf32>
    %52 = arith.mulf %50, %51 : vector<2x256xf32>
    %53 = arith.addf %46, %52 : vector<2x256xf32>
    %54 = vector.extract_strided_slice %4 {offsets = [0, 0, 3], sizes = [1, 2, 1], strides = [1, 1, 1]} : vector<2x2x4xf32> to vector<1x2x1xf32>
    %55 = vector.shape_cast %54 : vector<1x2x1xf32> to vector<2x1xf32>
    %56 = vector.extract_strided_slice %29 {offsets = [3, 0], sizes = [1, 256], strides = [1, 1]} : vector<4x256xf32> to vector<1x256xf32>
    %57 = vector.broadcast %55 : vector<2x1xf32> to vector<2x256xf32>
    %58 = vector.broadcast %56 : vector<1x256xf32> to vector<2x256xf32>
    %59 = arith.mulf %57, %58 : vector<2x256xf32>
    %60 = arith.addf %53, %59 : vector<2x256xf32>
    %61 = arith.addf %60, %7 : vector<2x256xf32>
    %62 = vector.extract_strided_slice %1 {offsets = [2, 0], sizes = [2, 256], strides = [1, 1]} : vector<4x256xf32> to vector<2x256xf32>
    %63 = vector.extract_strided_slice %3 {offsets = [1, 0, 0], sizes = [1, 4, 1], strides = [1, 1, 1]} : vector<2x4x1xf32> to vector<1x4x1xf32>
    %64 = vector.shape_cast %63 : vector<1x4x1xf32> to vector<4x1xf32>
    %65 = vector.extract_strided_slice %2 {offsets = [1, 0, 0], sizes = [1, 4, 1], strides = [1, 1, 1]} : vector<2x4x2xf32> to vector<1x4x1xf32>
    %66 = vector.shape_cast %65 : vector<1x4x1xf32> to vector<4x1xf32>
    %67 = vector.extract_strided_slice %62 {offsets = [0, 0], sizes = [1, 256], strides = [1, 1]} : vector<2x256xf32> to vector<1x256xf32>
    %68 = vector.broadcast %66 : vector<4x1xf32> to vector<4x256xf32>
    %69 = vector.broadcast %67 : vector<1x256xf32> to vector<4x256xf32>
    %70 = arith.mulf %68, %69 : vector<4x256xf32>
    %71 = vector.broadcast %64 : vector<4x1xf32> to vector<4x256xf32>
    %72 = arith.addf %71, %70 : vector<4x256xf32>
    %73 = vector.extract_strided_slice %2 {offsets = [1, 0, 1], sizes = [1, 4, 1], strides = [1, 1, 1]} : vector<2x4x2xf32> to vector<1x4x1xf32>
    %74 = vector.shape_cast %73 : vector<1x4x1xf32> to vector<4x1xf32>
    %75 = vector.extract_strided_slice %62 {offsets = [1, 0], sizes = [1, 256], strides = [1, 1]} : vector<2x256xf32> to vector<1x256xf32>
    %76 = vector.broadcast %74 : vector<4x1xf32> to vector<4x256xf32>
    %77 = vector.broadcast %75 : vector<1x256xf32> to vector<4x256xf32>
    %78 = arith.mulf %76, %77 : vector<4x256xf32>
    %79 = arith.addf %72, %78 : vector<4x256xf32>
    %cst_15 = arith.constant 0.000000e+00 : f32
    %80 = vector.broadcast %cst_15 : f32 to vector<4x256xf32>
    %81 = arith.cmpf ogt, %79, %80 : vector<4x256xf32>
    %82 = vector.broadcast %6 : f32 to vector<4x256xf32>
    %83 = arith.mulf %82, %79 : vector<4x256xf32>
    %84 = arith.select %81, %79, %83 : vector<4x256xi1>, vector<4x256xf32>
    %85 = vector.extract_strided_slice %5 {offsets = [1, 0, 0], sizes = [1, 2, 1], strides = [1, 1, 1]} : vector<2x2x1xf32> to vector<1x2x1xf32>
    %86 = vector.shape_cast %85 : vector<1x2x1xf32> to vector<2x1xf32>
    %87 = vector.extract_strided_slice %4 {offsets = [1, 0, 0], sizes = [1, 2, 1], strides = [1, 1, 1]} : vector<2x2x4xf32> to vector<1x2x1xf32>
    %88 = vector.shape_cast %87 : vector<1x2x1xf32> to vector<2x1xf32>
    %89 = vector.extract_strided_slice %84 {offsets = [0, 0], sizes = [1, 256], strides = [1, 1]} : vector<4x256xf32> to vector<1x256xf32>
    %90 = vector.broadcast %88 : vector<2x1xf32> to vector<2x256xf32>
    %91 = vector.broadcast %89 : vector<1x256xf32> to vector<2x256xf32>
    %92 = arith.mulf %90, %91 : vector<2x256xf32>
    %93 = vector.broadcast %86 : vector<2x1xf32> to vector<2x256xf32>
    %94 = arith.addf %93, %92 : vector<2x256xf32>
    %95 = vector.extract_strided_slice %4 {offsets = [1, 0, 1], sizes = [1, 2, 1], strides = [1, 1, 1]} : vector<2x2x4xf32> to vector<1x2x1xf32>
    %96 = vector.shape_cast %95 : vector<1x2x1xf32> to vector<2x1xf32>
    %97 = vector.extract_strided_slice %84 {offsets = [1, 0], sizes = [1, 256], strides = [1, 1]} : vector<4x256xf32> to vector<1x256xf32>
    %98 = vector.broadcast %96 : vector<2x1xf32> to vector<2x256xf32>
    %99 = vector.broadcast %97 : vector<1x256xf32> to vector<2x256xf32>
    %100 = arith.mulf %98, %99 : vector<2x256xf32>
    %101 = arith.addf %94, %100 : vector<2x256xf32>
    %102 = vector.extract_strided_slice %4 {offsets = [1, 0, 2], sizes = [1, 2, 1], strides = [1, 1, 1]} : vector<2x2x4xf32> to vector<1x2x1xf32>
    %103 = vector.shape_cast %102 : vector<1x2x1xf32> to vector<2x1xf32>
    %104 = vector.extract_strided_slice %84 {offsets = [2, 0], sizes = [1, 256], strides = [1, 1]} : vector<4x256xf32> to vector<1x256xf32>
    %105 = vector.broadcast %103 : vector<2x1xf32> to vector<2x256xf32>
    %106 = vector.broadcast %104 : vector<1x256xf32> to vector<2x256xf32>
    %107 = arith.mulf %105, %106 : vector<2x256xf32>
    %108 = arith.addf %101, %107 : vector<2x256xf32>
    %109 = vector.extract_strided_slice %4 {offsets = [1, 0, 3], sizes = [1, 2, 1], strides = [1, 1, 1]} : vector<2x2x4xf32> to vector<1x2x1xf32>
    %110 = vector.shape_cast %109 : vector<1x2x1xf32> to vector<2x1xf32>
    %111 = vector.extract_strided_slice %84 {offsets = [3, 0], sizes = [1, 256], strides = [1, 1]} : vector<4x256xf32> to vector<1x256xf32>
    %112 = vector.broadcast %110 : vector<2x1xf32> to vector<2x256xf32>
    %113 = vector.broadcast %111 : vector<1x256xf32> to vector<2x256xf32>
    %114 = arith.mulf %112, %113 : vector<2x256xf32>
    %115 = arith.addf %108, %114 : vector<2x256xf32>
    %116 = arith.addf %115, %62 : vector<2x256xf32>
    %117 = tpu.concatenate %61, %116 in 0 : vector<2x256xf32>, vector<2x256xf32> -> vector<4x256xf32>
    %c0_16 = arith.constant 0 : index
    %c0_17 = arith.constant 0 : index
    %c0_18 = arith.constant 0 : index
    %118 = vector.load %arg8[%c0_16, %c0_17, %c0_18] : memref<1x4x256xf32, #tpu.memory_space<vmem>>, vector<1x4x256xf32>
    %119 = vector.shape_cast %118 : vector<1x4x256xf32> to vector<4x256xf32>
    %120 = vector.shape_cast %117 : vector<4x256xf32> to vector<1x4x256xf32>
    tpu.vector_store %arg8[%c0_16, %c0_17, %c0_18], %120 {strides = array<i32>} : memref<1x4x256xf32, #tpu.memory_space<vmem>>, vector<1x4x256xf32>,
    return
  }
  func.func @transform_0(%arg0: i32, %arg1: i32) -> (i32, i32, i32) {
    %c0_i32 = arith.constant 0 : i32
    %c0_i32_0 = arith.constant 0 : i32
    return %arg0, %c0_i32, %arg1 : i32, i32, i32
  }
  func.func @transform_1(%arg0: i32, %arg1: i32) -> (i32, i32, i32) {
    %c0_i32 = arith.constant 0 : i32
    %c0_i32_0 = arith.constant 0 : i32
    %c0_i32_1 = arith.constant 0 : i32
    %c0_i32_2 = arith.constant 0 : i32
    return %c0_i32, %c0_i32_0, %c0_i32_1 : i32, i32, i32
  }
  func.func @transform_2(%arg0: i32, %arg1: i32) -> (i32, i32, i32) {
    %c0_i32 = arith.constant 0 : i32
    %c0_i32_0 = arith.constant 0 : i32
    %c0_i32_1 = arith.constant 0 : i32
    %c0_i32_2 = arith.constant 0 : i32
    return %c0_i32, %c0_i32_0, %c0_i32_1 : i32, i32, i32
  }
  func.func @transform_3(%arg0: i32, %arg1: i32) -> (i32, i32, i32) {
    %c0_i32 = arith.constant 0 : i32
    %c0_i32_0 = arith.constant 0 : i32
    %c0_i32_1 = arith.constant 0 : i32
    %c0_i32_2 = arith.constant 0 : i32
    return %c0_i32, %c0_i32_0, %c0_i32_1 : i32, i32, i32
  }
  func.func @transform_4(%arg0: i32, %arg1: i32) -> (i32, i32, i32) {
    %c0_i32 = arith.constant 0 : i32
    %c0_i32_0 = arith.constant 0 : i32
    %c0_i32_1 = arith.constant 0 : i32
    %c0_i32_2 = arith.constant 0 : i32
    return %c0_i32, %c0_i32_0, %c0_i32_1 : i32, i32, i32
  }
  func.func @transform_5(%arg0: i32, %arg1: i32) -> i32 {
    %c0_i32 = arith.constant 0 : i32
    %c0_i32_0 = arith.constant 0 : i32
    return %c0_i32 : i32
  }
  func.func @transform_6(%arg0: i32, %arg1: i32) -> (i32, i32, i32) {
    %c0_i32 = arith.constant 0 : i32
    %c0_i32_0 = arith.constant 0 : i32
    return %arg0, %c0_i32, %arg1 : i32, i32, i32
  }
}

</mosaic_0001>

<bundles_post_ra>
// kernel: tpu_custom_call.1
= control target key start
LH: loop header
LB: loop body
LE: loop exit
PB: predicated region body
PF: predicated region fallthrough
CT: control target
= control target key end

     0   :  { %s1061_s0 = inlined_call_operand.vmem [shape: f32[2,4,256], index: 0, kind: input, shape index: {}]   ;;  %s1062_s1 = inlined_call_operand.vmem [shape: f32[2,4,2], index: 1, kind: input, shape index: {}]   ;;  %s1063_s2 = inlined_call_operand.vmem [shape: f32[2,4,1], index: 2, kind: input, shape index: {}]   ;;  %s1064_s3 = inlined_call_operand.vmem [shape: f32[2,2,4], index: 3, kind: input, shape index: {}]   ;;  %s1065_s4 = inlined_call_operand.vmem [shape: f32[2,2,1], index: 4, kind: input, shape index: {}]   ;;  %s1066_s5 = inlined_call_operand.<no memory space> [shape: f32[1], index: 5, kind: input, shape index: {}]   ;;  %s1067_s6 = inlined_call_operand.hbm [shape: f32[2,4,256], index: 6, kind: output, shape index: {}]  }
   0x1   :  { %11 = sst [smem:[#allocation2]] %s1066_s5 }
   0x2   :  { %12 = vsyncpa [#allocation4], 0 }
   0x3   :  { %14 = vsyncpa [#allocation4 + $0x1], 0  ;;  %s884_s23 = smov 0   ;;  %s886_s24 = smov 0  }
   0x4   :  { %s888_s25 = smov 0   ;;  %s890_s26 = smov 0  }
   0x5   :  { %s892_s27 = smov 0   ;;  %s894_s28 = smov 0  }
   0x6 LB: > { %s679_s5 = sadd.s32 4294967295, %s839_s28   ;;  %s680_s29 = sadd.s32 4294967294, %s839_s28   ;;  %s839_s28 = sphi %s894_s28, %s20_s28   ;;  %s835_s27 = sphi %s892_s27, %s1074_s27   ;;  %s831_s26 = sphi %s890_s26, %s1073_s26   ;;  %s827_s25 = sphi %s888_s25, %s1072_s25   ;;  %s823_s24 = sphi %s886_s24, %s1071_s24   ;;  %s819_s23 = sphi %s884_s23, %s1070_s23  }
   0x7   : > { %s32_s30 = sadd.s32 1, %s835_s27  ;;  %s174_s7 = sadd.s32 1, %s827_s25 }
   0x8   : > { %p34_p0 = scmp.ge.s32.totalorder %s32_s30, 2  ;;  %p184_p1 = scmp.ne.s32.totalorder %s827_s25, %s823_s24 }
   0x9   : > { %p185_p2 = scmp.eq.s32.totalorder %s679_s5, 1  ;;  %p190_p3 = scmp.ne.s32.totalorder %s823_s24, %s819_s23 }
   0xa   : > { %s1076_s30 = smov (%p34_p0, %s32_s30), 0  ;;  %p191_p5 = scmp.eq.s32.totalorder %s680_s29, 1 }
   0xb   : > { %p924_p4 = por %p185_p2, %p184_p1  ;;  %s169_s9 = ssub.s32 %s835_s27, %s1076_s30 }
   0xc   : > { %p683_p6 = scmp.ge.s32.totalorder %s839_s28, 1  ;;  %p172_p7 = scmp.eq.s32.totalorder %s169_s9, 0 }
   0xd   : > { %p931_p8 = por %p191_p5, %p190_p3  ;;  %p237_p9 = scmp.lt.s32.totalorder %s839_s28, 3 }
   0xe   : > { %s937_s11 = scalar_select %p172_p7, %s827_s25, %s174_s7  }
   0xf   : > { %p238_p10 = pnand %p683_p6, %p237_p9 }
  0x10   : > { %p272_p11 = scmp.lt.s32.totalorder (!%p238_p10), %s831_s26, 1  ;;  %s291_s18 = sld [smem:[#allocation2]] (!%p238_p10) }
  0x11   : > { %241 = sbr.rel (%p238_p10) target bundleno = 205 (0xcd), region = 44  ;;  %s268_s19 = sand.u32 (!%p238_p10), 1, %s823_s24  }
  0x12   : > { %s684_s20 = sshll.u32 (!%p238_p10), %s268_s19, 3  ;;  %s693_s21 = sshll.u32 (!%p238_p10), %s831_s26, 7 }
  0x13   : > { %s270_s22 = scalar_lea.vmem (!%p238_p10), [#allocation3], %s684_s20  ;;  %s601_s9 = scalar_lea.hbm (!%p238_p10), %s1067_s6, %s693_s21 }
  0x14   : > { %s603_s5 = sshll.u32 (!%p238_p10), %s270_s22, 4  ;;  %s587_s12 = scalar_lea.sflag (!%p238_p10), [#allocation4], %s268_s19  ;;  %s604_s5 = int_to_ptr.vmem [resolvable:$true] %s603_s5 }
  0x16   : > { %v286_v0 = vld [vmem:[%s1063_s2 + $0x4] sm:$0xf]  ;;  %v841_v2 = vmov 0   ;;  %v283_v3 = vld [vmem:[%s1062_s1] sm:$0xf]  ;;  %v842_v4 = vmov 1   ;;  %v298_v12 = vlaneseq  ;;  %v353_v54 = vstv %s291_s18 }
  0x17   : > { %v284_v1 = vld [vmem:[%s1062_s1 + $0x4] sm:$0xf]  ;;  %754 = vset.pattern.permute.xlu1 %v841_v2  ;;  %753 = vset.pattern.permute.xlu0 %v841_v2  ;;  %v285_v5 = vld [vmem:[%s1063_s2] sm:$0xf]  ;;  %v843_v10 = vmov 2   ;;  %v844_v11 = vmov 3  }
  0x18   : > { %459 = vperm.xlu1 %754, %v286_v0   ;;  %434 = vperm.xlu0 %753, %v284_v1   ;;  %v288_v6 = vld [vmem:[%s1064_s3 + $0x2] sm:$0x3]  ;;  %v287_v7 = vld [vmem:[%s1064_s3] sm:$0x3]  ;;  %s273_s13 = scalar_select %p272_p11, %s831_s26, 1  ;;  %v299_v13 = vshrl.u32 %v298_v12, 7 }
  0x19   : > { %v290_v8 = vld [vmem:[%s1065_s4 + $0x2] sm:$0x3]  ;;  %v289_v9 = vld [vmem:[%s1065_s4] sm:$0x3]  ;;  %vm578_vm4 = vcmask 1041408  }
  0x1a   : > { %s692_s14 = sshll.u32 %s273_s13, 3  ;;  %v968_v14 = vsub.s32 2, %v299_v13  ;;  %v443_v15 = vsub.s32 6, %v299_v13  ;;  %v972_v17 = vsub.s32 0, %v299_v13  ;;  %v304_v18 = vsub.s32 4, %v299_v13  ;;  %s763_s13 = scalar_lea.vmem %s604_s5, 128 }
  0x1b   : > { %s279_s17 = scalar_lea.vmem %s1061_s0, %s692_s14  ;;  %v977_v21 = vsub.s32 3, %v299_v13  ;;  %v474_v22 = vsub.s32 7, %v299_v13  ;;  %v987_v29 = vsub.s32 1, %v299_v13  ;;  %v335_v30 = vsub.s32 5, %v299_v13  ;;  %p764_p12 = scmp.ne.s32.totalorder %s604_s5, %s763_s13 }
  0x1c   : > { %755 = vset.pattern.permute.xlu1 %v842_v4  ;;  %294 = vperm.xlu0 %753, %v283_v3   ;;  %v970_v16 = vld [vmem:[%s279_s17] sm:$0xff]  ;;  %s845_s14 = smov [#allocation3]  }
  0x1d   : > { %465 = vperm.xlu1 %755, %v284_v1   ;;  %v440_v19 = vrot.slane %v970_v16, %v968_v14  ;;  %v444_v20 = vrot.slane %v970_v16, %v443_v15  ;;  %v301_v23 = vrot.slane %v970_v16, %v972_v17  ;;  %v305_v24 = vrot.slane %v970_v16, %v304_v18  ;;  %p765_p13 = pnand %p764_p12, %p924_p4  ;;  %s767_s26 = sshll.u32 %s845_s14, 4  ;;  %s768_s26 = int_to_ptr.vmem [resolvable:$false] %s767_s26 }
  0x1e   : > { %v471_v27 = vrot.slane %v970_v16, %v977_v21  ;;  %v475_v28 = vrot.slane %v970_v16, %v474_v22  ;;  %v332_v39 = vrot.slane %v970_v16, %v987_v29  ;;  %v336_v40 = vrot.slane %v970_v16, %v335_v30  ;;  %s769_s15 = scalar_lea.vmem %s768_s26, 256  ;;  %p770_p1 = scmp.lt.s32.totalorder %s604_s5, %s768_s26 }
  0x1f   : > { %v450_v25 = vrot.slane %v440_v19, %v968_v14  ;;  %v454_v26 = vrot.slane %v444_v20, %v968_v14  ;;  %v311_v33 = vrot.slane %v301_v23, %v972_v17  ;;  %v315_v34 = vrot.slane %v305_v24, %v972_v17  ;;  %p766_p0 = pneg %p765_p13  ;;  %p771_p2 = scmp.lt.s32.totalorder %s769_s15, %s763_s13 }
  0x20   : > { %320 = vperm.xlu0 %753, %v285_v5   ;;  %v481_v37 = vrot.slane %v471_v27, %v977_v21  ;;  %v485_v38 = vrot.slane %v475_v28, %v977_v21  ;;  %v342_v49 = vrot.slane %v332_v39, %v987_v29  ;;  %v346_v50 = vrot.slane %v336_v40, %v987_v29 }
  0x21   : > { %326 = vperm.xlu1 %755, %v283_v3   ;;  %v428_v30 = vcombine.high %v970_v16, %v970_v16  ;;  %p772_p3 = por %p771_p2, %p770_p1 }
  0x23   : > { %p773_p5 = pnand %p772_p3, %p766_p0 }
  0x24   : > { %498 = vperm.xlu0 %753, %v288_v6  }
  0x25   : > { %756 = vset.pattern.permute.xlu1 %v841_v2 }
  0x26   : > { %360 = vperm.xlu1 %756, %v287_v7  }
  0x28   : > { %513 = vperm.xlu0 %753, %v290_v8  }
  0x2a   : > { %757 = vset.pattern.permute.xlu1 %v842_v4 }
  0x2b   : > { %519 = vperm.xlu1 %757, %v288_v6  }
  0x2c   : > { %375 = vperm.xlu0 %753, %v289_v9  }
  0x2f   : > { %381 = vperm.xlu1 %757, %v287_v7  }
  0x30   : > { %758 = vset.pattern.permute.xlu0 %v843_v10 }
  0x31   : > { %535 = vperm.xlu0 %758, %v288_v6  }
  0x33   : > { %759 = vset.pattern.permute.xlu1 %v843_v10 }
  0x34   : > { %397 = vperm.xlu1 %759, %v287_v7  }
  0x35   : > { %761 = vset.pattern.permute.xlu0 %v844_v11 }
  0x36   : > { %413 = vperm.xlu0 %761, %v287_v7  }
  0x38   : > { %760 = vset.pattern.permute.xlu1 %v844_v11 }
  0x39   : > { %551 = vperm.xlu1 %760, %v288_v6  }
  0x93   : > { %v460_v31 = vpop.permute.xlu1 %459  ;;  %v435_v32 = vpop.permute.xlu0 %434 }
  0x94   : > { %v455_v35 = vmul.f32 %v450_v25, %v435_v32  ;;  %v456_v36 = vmul.f32 %v454_v26, %v435_v32 }
  0x96   : > { %v462_v45 = vadd.f32 %v460_v31, %v455_v35  ;;  %v463_v46 = vadd.f32 %v460_v31, %v456_v36 }
  0x97   : > { %v295_v41 = vpop.permute.xlu0 %294 }
  0x98   : > { %v316_v42 = vmul.f32 %v311_v33, %v295_v41  ;;  %v317_v43 = vmul.f32 %v315_v34, %v295_v41  ;;  %v466_v44 = vpop.permute.xlu1 %465 }
  0x99   : > { %v486_v47 = vmul.f32 %v481_v37, %v466_v44  ;;  %v487_v48 = vmul.f32 %v485_v38, %v466_v44 }
  0x9b   : > { %v488_v51 = vadd.f32 %v486_v47, %v462_v45  ;;  %v489_v52 = vadd.f32 %v487_v48, %v463_v46  ;;  %v321_v53 = vpop.permute.xlu0 %320 }
  0x9c   : > { %v323_v55 = vadd.f32 %v321_v53, %v316_v42  ;;  %v324_v56 = vadd.f32 %v321_v53, %v317_v43  ;;  %v327_v57 = vpop.permute.xlu1 %326 }
  0x9d   : > { %v347_v58 = vmul.f32 %v342_v49, %v327_v57  ;;  %v348_v59 = vmul.f32 %v346_v50, %v327_v57  ;;  %v492_v60 = vmul.f32 %v488_v51, %v353_v54  ;;  %v493_v61 = vmul.f32 %v489_v52, %v353_v54 }
  0x9e   : > { %vm490_vm0 = vcmp.gt.f32.partialorder %v488_v51, 0.0  ;;  %vm491_vm1 = vcmp.gt.f32.partialorder %v489_v52, 0.0 }
  0x9f   : > { %v499_v62 = vpop.permute.xlu0 %498  ;;  %v349_v63 = vadd.f32 %v347_v58, %v323_v55  ;;  %v350_v0 = vadd.f32 %v348_v59, %v324_v56  ;;  %v494_v4 = vsel %vm490_vm0, %v488_v51, %v492_v60  ;;  %v495_v5 = vsel %vm491_vm1, %v489_v52, %v493_v61 }
  0xa0   : > { %v504_v9 = vrot.slane %v494_v4, %v972_v17  ;;  %v508_v10 = vrot.slane %v495_v5, %v972_v17  ;;  %v525_v26 = vrot.slane %v494_v4, %v987_v29  ;;  %v529_v27 = vrot.slane %v495_v5, %v987_v29 }
  0xa1   : > { %v361_v1 = vpop.permute.xlu1 %360  ;;  %vm351_vm2 = vcmp.gt.f32.partialorder %v349_v63, 0.0  ;;  %vm352_vm3 = vcmp.gt.f32.partialorder %v350_v0, 0.0  ;;  %v354_v2 = vmul.f32 %v353_v54, %v349_v63  ;;  %v355_v3 = vmul.f32 %v353_v54, %v350_v0 }
  0xa2   : > { %v509_v18 = vmul.f32 %v504_v9, %v499_v62  ;;  %v510_v19 = vmul.f32 %v508_v10, %v499_v62  ;;  %v541_v32 = vrot.slane %v494_v4, %v968_v14  ;;  %v545_v33 = vrot.slane %v495_v5, %v968_v14 }
  0xa3   : > { %v514_v6 = vpop.permute.xlu0 %513  ;;  %v356_v7 = vsel %vm351_vm2, %v349_v63, %v354_v2  ;;  %v357_v8 = vsel %vm352_vm3, %v350_v0, %v355_v3  ;;  %v557_v52 = vrot.slane %v494_v4, %v977_v21  ;;  %v561_v53 = vrot.slane %v495_v5, %v977_v21 }
  0xa4   : > { %v366_v12 = vrot.slane %v356_v7, %v972_v17  ;;  %v370_v13 = vrot.slane %v357_v8, %v972_v17  ;;  %v387_v24 = vrot.slane %v356_v7, %v987_v29  ;;  %v391_v25 = vrot.slane %v357_v8, %v987_v29 }
  0xa5   : > { %v403_v36 = vrot.slane %v356_v7, %v968_v14  ;;  %v407_v37 = vrot.slane %v357_v8, %v968_v14  ;;  %v516_v38 = vadd.f32 %v514_v6, %v509_v18  ;;  %v517_v39 = vadd.f32 %v514_v6, %v510_v19 }
  0xa6   : > { %v520_v11 = vpop.permute.xlu1 %519  ;;  %v371_v22 = vmul.f32 %v366_v12, %v361_v1  ;;  %v372_v23 = vmul.f32 %v370_v13, %v361_v1  ;;  %v419_v44 = vrot.slane %v356_v7, %v977_v21  ;;  %v423_v45 = vrot.slane %v357_v8, %v977_v21 }
  0xa7   : > { %v376_v15 = vpop.permute.xlu0 %375  ;;  %v530_v34 = vmul.f32 %v525_v26, %v520_v11  ;;  %v531_v35 = vmul.f32 %v529_v27, %v520_v11  ;;  %v566_v59 = vrot.slane %v970_v16, 2  ;;  %v567_v60 = vrot.slane %v428_v30, 2 }
  0xa8   : > { %v378_v40 = vadd.f32 %v376_v15, %v371_v22  ;;  %v379_v29 = vadd.f32 %v376_v15, %v372_v23 }
  0xa9   : > { %v532_v51 = vadd.f32 %v530_v34, %v516_v38  ;;  %v533_v14 = vadd.f32 %v531_v35, %v517_v39 }
  0xaa   : > { %v382_v20 = vpop.permute.xlu1 %381 }
  0xab   : > { %v392_v31 = vmul.f32 %v387_v24, %v382_v20  ;;  %v393_v17 = vmul.f32 %v391_v25, %v382_v20 }
  0xac   : > { %v536_v28 = vpop.permute.xlu0 %535 }
  0xad   : > { %v394_v46 = vadd.f32 %v392_v31, %v378_v40  ;;  %v395_v47 = vadd.f32 %v393_v17, %v379_v29  ;;  %v546_v48 = vmul.f32 %v541_v32, %v536_v28  ;;  %v547_v49 = vmul.f32 %v545_v33, %v536_v28 }
  0xaf   : > { %v398_v41 = vpop.permute.xlu1 %397  ;;  %v548_v61 = vadd.f32 %v546_v48, %v532_v51  ;;  %v549_v62 = vadd.f32 %v547_v49, %v533_v14 }
  0xb0   : > { %v408_v42 = vmul.f32 %v403_v36, %v398_v41  ;;  %v409_v43 = vmul.f32 %v407_v37, %v398_v41 }
  0xb1   : > { %v414_v50 = vpop.permute.xlu0 %413 }
  0xb2   : > { %v410_v54 = vadd.f32 %v408_v42, %v394_v46  ;;  %v411_v55 = vadd.f32 %v409_v43, %v395_v47  ;;  %v424_v56 = vmul.f32 %v419_v44, %v414_v50  ;;  %v425_v57 = vmul.f32 %v423_v45, %v414_v50 }
  0xb4   : > { %v552_v58 = vpop.permute.xlu1 %551  ;;  %v426_v1 = vadd.f32 %v424_v56, %v410_v54  ;;  %v427_v2 = vadd.f32 %v425_v57, %v411_v55 }
  0xb5   : > { %v562_v63 = vmul.f32 %v557_v52, %v552_v58  ;;  %v563_v0 = vmul.f32 %v561_v53, %v552_v58 }
  0xb6   : > { %v430_v6 = vadd.f32 %v426_v1, %v970_v16  ;;  %v431_v7 = vadd.f32 %v428_v30, %v427_v2 }
  0xb7   : > { %v564_v3 = vadd.f32 %v562_v63, %v548_v61  ;;  %v565_v21 = vadd.f32 %v563_v0, %v549_v62 }
  0xb9   : > { %v570_v4 = vadd.f32 %v566_v59, %v564_v3  ;;  %v571_v5 = vadd.f32 %v567_v60, %v565_v21 }
  0xbb   : > { %v574_v8 = vrot.slane %v570_v4, 6  ;;  %v575_v9 = vrot.slane %v571_v5, 6 }
  0xbd   : > { %v579_v10 = vsel %vm578_vm4, %v430_v6, %v574_v8  ;;  %v580_v11 = vsel %vm578_vm4, %v431_v7, %v575_v9 }
  0xbe   : > { %v583_v12 = vcombine.low %v579_v10, %v580_v11 }
  0xc0   : > { %585 = vst [vmem:[%s270_s22] sm:$0xff] %v583_v12 }
  0xc1   : > { %776 = shalt.err (!%p773_p5)
}
  0xc2   : > { %s777_s16 = scalar_lea.hbm %s601_s9, 128  ;;  %s781_s19 = scalar_lea.hbm %s1067_s6, 256 }
  0xc3   : > { %p778_p6 = scmp.ne.s32.totalorder %s601_s9, %s777_s16  ;;  %p782_p10 = scmp.lt.s32.totalorder %s601_s9, %s1067_s6 }
  0xc4   : > { %p783_p11 = scmp.lt.s32.totalorder %s781_s19, %s777_s16 }
  0xc5   : > { %p779_p7 = pnand %p778_p6, %p924_p4 }
  0xc6   : > { %p784_p12 = por %p783_p11, %p782_p10 }
  0xc7   : > { %p780_p9 = pneg %p779_p7 }
  0xc9   : > { %p785_p13 = pnand %p784_p12, %p780_p9 }
  0xcb   : > { %788 = shalt.err (!%p785_p13)
}
  0xcc   : > { %694 = dma.vmem_to_hbm [thread:$0]  (%p924_p4), %s604_s5, 128, %s601_s9, %s587_s12  }
  0xcd PF: > { %p700_p0 = scmp.ge.s32.totalorder %s839_s28, 2  ;;  %s615_s22 = sand.u32 1, %s819_s23  }
  0xce   : > { %s616_s29 = scalar_lea.sflag [#allocation4], %s615_s22 }
  0xcf   : > { %p697_p1 = pnand %p700_p0, %p931_p8 }
  0xd1   : > { %p698_p2 = pneg %p697_p1 }
  0xd3   : > { %814 = dma.done.wait (%p698_p2), %s616_s29, 128  }
  0xd4   : > { %816 = vsyncadd (%p698_p2), %s616_s29, 4294967168  ;;  %s20_s28 = sadd.s32 1, %s839_s28   ;;  %s1070_s23 = smov %s823_s24 }
  0xd5   : > { %p17_p3 = scmp.ge.s32.totalorder %s20_s28, 4   ;;  %s1071_s24 = smov %s827_s25 }
  0xd6   : > { %s1072_s25 = smov %s937_s11  ;;  %s1073_s26 = smov %s835_s27 }
  0xd7   : > { %s1074_s27 = smov %s1076_s30  ;;  %19 = sbr.rel (!%p17_p3) target bundleno = 6 (0x6), region = 79 }
  0xdc   :  { %621 = vsyncpa [#allocation4], 1 }
  0xdd   :  { %623 = vsyncpa [#allocation4 + $0x1], 1 }

</bundles_post_ra>
